<compile_context>
chip_gen: v7x
topology: tpu7x:2x2x1
jax: 0.10.0
libtpu: 0.0.40
codegen_flags: <defaults>
</compile_context>

<pallas_src>
import jax
import jax.numpy as jnp
import numpy as np
from jax.experimental import pallas as pl
from jax.experimental.pallas import tpu as pltpu


# ----------------------------------------------------------------------------
# Primary path: metadata-only aliased "view" (zero DMA).
# ----------------------------------------------------------------------------
def _alias_view_kernel(x_ref, o_ref):
    # Output aliases the input HBM buffer; a view is pure metadata, so there is
    # nothing to move.  touch() keeps a read+write dependency on the otherwise
    # untouched output ref so Mosaic/XLA keep (and order) the empty kernel.
    pltpu.touch(o_ref)


def _alias_view(x):
    """Metadata-only pass: output aliases x's HBM buffer, no data movement."""
    return pl.pallas_call(
        _alias_view_kernel,
        out_shape=jax.ShapeDtypeStruct(x.shape, x.dtype),
        in_specs=[pl.BlockSpec(memory_space=pl.ANY)],
        out_specs=pl.BlockSpec(memory_space=pl.ANY),
        input_output_aliases={0: 0},
        compiler_params=pltpu.CompilerParams(has_side_effects=True),
    )(x)


_ALIAS_PATH_OK = None


def _alias_path_supported():
    """Probe once (tiny tensor) whether the aliased ANY-space path lowers/runs."""
    global _ALIAS_PATH_OK
    if _ALIAS_PATH_OK is None:
        try:
            probe = jnp.arange(8 * 128, dtype=jnp.float32).reshape(8, 128)
            expect = np.asarray(probe).copy()
            out = jax.block_until_ready(
                jax.jit(_alias_view, donate_argnums=(0,))(probe))
            _ALIAS_PATH_OK = bool(np.array_equal(np.asarray(out), expect))
        except Exception:
            _ALIAS_PATH_OK = False
    return _ALIAS_PATH_OK


# ----------------------------------------------------------------------------
# Fallback path: streamed identity copy over a lane-dense slab.
# ----------------------------------------------------------------------------
def _copy_kernel(x_ref, o_ref):
    o_ref[...] = x_ref[...]


def _pick_lane(total, max_lane=4096):
    """Largest power-of-two multiple of 128 (<= max_lane) dividing total."""
    lane = 0
    w = 128
    while w <= max_lane and total % w == 0:
        lane = w
        w *= 2
    return lane


def _pick_block_rows(rows, lane, itemsize):
    """~2 MiB tiles; prefer a divisor of rows (full tiles) and >= 2 grid steps."""
    sub_min = max(8, 32 // itemsize)          # f32:8, bf16:16, int8/fp8:32
    if rows <= sub_min:
        return rows                           # full-extent block (legal)
    target_rows = max(sub_min, (2 * 1024 * 1024) // (lane * itemsize))
    cap = min(rows, target_rows)
    if rows >= 2 * sub_min:                   # keep >= 2 steps (v7x megacore)
        cap = min(cap, rows // 2)
    cap = max(sub_min, (cap // sub_min) * sub_min)
    br = cap
    while br >= sub_min:                      # largest divisor -> unmasked vst
        if rows % br == 0:
            return br
        br -= sub_min
    return cap                                # ragged tail; Pallas masks it


# ----------------------------------------------------------------------------
# Public wrapper: equivalent of PView(channels, size).forward(x).
# ----------------------------------------------------------------------------
def pview_forward(x, channels, size):
    total = x.size
    per_item = channels * size * size
    assert total % per_item == 0, "input numel not divisible by C*size*size"
    out_shape = (total // per_item, channels, size, size)

    # Primary: metadata-only aliased kernel (O(1) HBM traffic on all gens).
    if _alias_path_supported():
        return _alias_view(x).reshape(out_shape)

    # Fallback: tiled identity copy.
    flat = x.reshape(-1)
    lane = _pick_lane(total)
    if lane == 0:
        # numel not a multiple of 128: a tiled copy would need a padded copy in
        # the wrapper (extra HBM traffic for zero benefit) -> metadata only.
        # TODO(synk): ragged-tail copy kernel if a Pallas copy is mandatory
        # for non-128-multiple sizes.
        return flat.reshape(out_shape)

    rows = total // lane
    itemsize = jnp.dtype(x.dtype).itemsize
    block_rows = _pick_block_rows(rows, lane, itemsize)
    grid = (pl.cdiv(rows, block_rows),)
    slab = flat.reshape(rows, lane)

    out_slab = pl.pallas_call(
        _copy_kernel,
        out_shape=jax.ShapeDtypeStruct((rows, lane), x.dtype),
        grid_spec=pltpu.PrefetchScalarGridSpec(
            num_scalar_prefetch=0,
            grid=grid,
            in_specs=[pl.BlockSpec((block_rows, lane), lambda i: (i, 0))],
            out_specs=pl.BlockSpec((block_rows, lane), lambda i: (i, 0)),
        ),
        compiler_params=pltpu.CompilerParams(
            dimension_semantics=("parallel",)),
        cost_estimate=pl.CostEstimate(
            flops=0, transcendentals=0,
            bytes_accessed=2 * total * itemsize),
        # Identity copy: in-place writeback into the aliased slab is safe and
        # lets a donating caller avoid a fresh HBM allocation.
        input_output_aliases={0: 0},
    )(slab)

    return out_slab.reshape(out_shape)


if __name__ == "__main__":
    # PView has no parameters; only (channels, size) configure it.
    channels, size = 4, 16
    batch = 2

    key = jax.random.PRNGKey(0)
    # Common PView usage: flattened-per-item tensor, NCHW element order.
    x = jax.random.normal(key, (batch, channels * size * size), dtype=jnp.float32)

    # Snapshot the expected result BEFORE the call: x's buffer is donated to
    # the kernel (the aliased no-op path hands it straight to the output).
    ref = np.asarray(x).reshape(-1, channels, size, size)

    fwd = jax.jit(lambda t: pview_forward(t, channels, size),
                  donate_argnums=(0,))
    y = jax.block_until_ready(fwd(x))

    assert y.shape == (batch, channels, size, size)
    assert y.dtype == jnp.float32
    assert np.array_equal(np.asarray(y), ref)

    print("KERNEL_OK")
</pallas_src>

<mosaic_0001>
module attributes {stable_mosaic.version = 11 : i64} {
  func.func @_copy_kernel(%arg0: i32, %arg1: memref<1x2048xf32, #tpu.memory_space<vmem>>, %arg2: memref<1x2048xf32, #tpu.memory_space<vmem>>) attributes {dimension_semantics = [#tpu.dimension_semantics<parallel>], iteration_bounds = array<i64: 1>, scalar_prefetch = 0 : i64, scratch_operands = 0 : i64, tpu.core_type = #tpu.core_type<tc>, window_params = [{transform_indices = @transform_0, window_bounds = array<i64: 1, 2048>}, {transform_indices = @transform_1, window_bounds = array<i64: 1, 2048>}]} {
    %c0 = arith.constant 0 : index
    %c0_0 = arith.constant 0 : index
    %0 = vector.load %arg1[%c0, %c0_0] : memref<1x2048xf32, #tpu.memory_space<vmem>>, vector<1x2048xf32>
    %c0_1 = arith.constant 0 : index
    %c0_2 = arith.constant 0 : index
    %1 = vector.load %arg2[%c0_1, %c0_2] : memref<1x2048xf32, #tpu.memory_space<vmem>>, vector<1x2048xf32>
    tpu.vector_store %arg2[%c0_1, %c0_2], %0 {strides = array<i32>} : memref<1x2048xf32, #tpu.memory_space<vmem>>, vector<1x2048xf32>,
    return
  }
  func.func @transform_0(%arg0: i32) -> (i32, i32) {
    %c0_i32 = arith.constant 0 : i32
    %c0_i32_0 = arith.constant 0 : i32
    return %arg0, %c0_i32 : i32, i32
  }
  func.func @transform_1(%arg0: i32) -> (i32, i32) {
    %c0_i32 = arith.constant 0 : i32
    %c0_i32_0 = arith.constant 0 : i32
    return %arg0, %c0_i32 : i32, i32
  }
}

</mosaic_0001>

<bundles_post_ra>
// kernel: _lambda_.1
= control target key start
LH: loop header
LB: loop body
LE: loop exit
PB: predicated region body
PF: predicated region fallthrough
CT: control target
= control target key end

     0   :  { %s38_s0 = inlined_call_operand.vmem [shape: f32[1,2048], index: 0, kind: input, shape index: {}, may-alias: {0,1}]   ;;  %s39_s1 = inlined_call_operand.vmem [shape: f32[1,2048], index: 1, kind: output, shape index: {}, may-alias: {0,1}]  }
   0x1   :  { %v8_v0 = vld [vmem:[%s38_s0] sm:$0xff]  ;;  %v9_v1 = vld [vmem:[%s38_s0 + $0x8] sm:$0xff] }
   0x2   :  { %10 = vst [vmem:[%s39_s1] sm:$0xff] %v8_v0  ;;  %11 = vst [vmem:[%s39_s1 + $0x8] sm:$0xff] %v9_v1 }

</bundles_post_ra>
